<compile_context>
chip_gen: v5e
topology: v5e:2x2
jax: 0.10.0
libtpu: 0.0.40
codegen_flags: <defaults>
</compile_context>

<pallas_src>
import jax
import jax.numpy as jnp
from jax.experimental import pallas as pl
from jax.experimental.pallas import tpu as pltpu

EPS = 1e-5                 # PyTorch nn.LayerNorm default
_MXU_DTYPE = jnp.bfloat16  # MXU fast path on v5e/v6e/v7x


# ---------------------------------------------------------------------------
# Parameter setup (hoisted out of the per-call path)
# ---------------------------------------------------------------------------
def prepare_prenorm_linear_params(gamma, beta, w, b, *, mxu_dtype=_MXU_DTYPE):
    """Fold the LayerNorm affine into the projection, once, in f32:
         (xhat*gamma + beta) @ W.T + b == xhat @ (gamma[:,None]*W.T) + (beta@W.T + b)
       `w` is the PyTorch-layout (out, in) Linear weight."""
    w_t = jnp.asarray(w, jnp.float32).T                    # (D_in, D_out) == W.T
    gamma_f = jnp.asarray(gamma, jnp.float32)
    beta_f = jnp.asarray(beta, jnp.float32)
    b_f = jnp.asarray(b, jnp.float32)
    w_folded = (gamma_f[:, None] * w_t).astype(mxu_dtype)  # (D, D), bf16 MXU operand
    bias_folded = beta_f @ w_t + b_f                       # (D,), f32
    return w_folded, bias_folded


# ---------------------------------------------------------------------------
# Kernels
# ---------------------------------------------------------------------------
def _make_resident_kernel(D, n_chunks, chunk_rows):
    """Resident (D, D) weight; one (tm, D) row tile per grid step, processed in
    `n_chunks` static sub-chunks so LN of chunk k+1 overlaps the MXU on chunk k."""
    inv_d = 1.0 / float(D)

    def kernel(x_ref, w_ref, bias_ref, o_ref):
        bias = bias_ref[...].astype(jnp.float32)
        for c in range(n_chunks):
            r0 = c * chunk_rows
            x = x_ref[pl.ds(r0, chunk_rows), :].astype(jnp.float32)
            # One-pass LayerNorm stats (biased variance, eps inside rsqrt).
            s1 = jnp.sum(x, axis=-1, keepdims=True)
            s2 = jnp.sum(x * x, axis=-1, keepdims=True)
            mean = s1 * inv_d
            var = jnp.maximum(s2 * inv_d - mean * mean, 0.0)
            xhat = (x - mean) * jax.lax.rsqrt(var + EPS)
            out = jnp.dot(xhat.astype(w_ref.dtype), w_ref[...],
                          preferred_element_type=jnp.float32)
            o_ref[pl.ds(r0, chunk_rows), :] = (out + bias).astype(o_ref.dtype)

    return kernel


def _make_ntiled_kernel(D):
    """N-tiled path for large D: normalized rows are computed once per row tile
    (inner grid axis j == 0) into a bf16 VMEM scratch and reused across all
    (D, tn) weight stripes."""
    inv_d = 1.0 / float(D)

    def kernel(x_ref, w_ref, bias_ref, o_ref, y_scr):
        @pl.when(pl.program_id(1) == 0)
        def _():
            x = x_ref[...].astype(jnp.float32)
            s1 = jnp.sum(x, axis=-1, keepdims=True)
            s2 = jnp.sum(x * x, axis=-1, keepdims=True)
            mean = s1 * inv_d
            var = jnp.maximum(s2 * inv_d - mean * mean, 0.0)
            y_scr[...] = ((x - mean) * jax.lax.rsqrt(var + EPS)).astype(y_scr.dtype)

        out = jnp.dot(y_scr[...], w_ref[...], preferred_element_type=jnp.float32)
        o_ref[...] = (out + bias_ref[...].astype(jnp.float32)).astype(o_ref.dtype)

    return kernel


# ---------------------------------------------------------------------------
# Sizing helpers
# ---------------------------------------------------------------------------
def _vmem_capacity_bytes():
    try:
        cap = getattr(pltpu.get_tpu_info(), "vmem_capacity_bytes", None)
        if cap:
            return int(cap)
    except Exception:
        pass
    return 64 << 20  # conservative default (v7x per-TensorCore)


def _sublane(itemsize):
    # f32 -> 8, bf16 -> 16, int8/fp8 -> 32 sublane-packed rows.
    return max(8, 32 // int(itemsize))


def _pick_chunks(tm, sub):
    for n in (4, 2):
        if tm % (n * sub) == 0:
            return n
    return 1


def _resident_footprint(tm, D, xi, oi, wi, n_chunks, single_weight_buffer):
    w_bufs = 1 if single_weight_buffer else 2
    return (w_bufs * D * D * wi                   # resident folded weight
            + 2 * tm * D * xi                     # x tile, double-buffered
            + 2 * tm * D * oi                     # out tile, double-buffered
            + 3 * pl.cdiv(tm, n_chunks) * D * 4   # per-chunk f32 temporaries
            + 4 * D * 4)                          # fused bias + headroom


# ---------------------------------------------------------------------------
# Wrapper
# ---------------------------------------------------------------------------
def prenorm_linear(x, w_folded, bias_folded, *, tile_m=None):
    """x: (..., D); w_folded: (D, D) == gamma[:,None] * W.T (bf16);
    bias_folded: (D,) == beta @ W.T + b (f32)."""
    orig_shape = x.shape
    D = orig_shape[-1]
    M = 1
    for s in orig_shape[:-1]:
        M *= int(s)

    x2 = x.reshape(M, D)
    bias2 = bias_folded.reshape(1, D).astype(jnp.float32)

    xi = jnp.dtype(x.dtype).itemsize
    oi = xi
    wi = jnp.dtype(w_folded.dtype).itemsize
    sub = _sublane(xi)

    vmem_cap = _vmem_capacity_bytes()
    budget = max(16 << 20, vmem_cap - (12 << 20))       # leave Mosaic headroom
    m_cap = pl.cdiv(max(M, 1), sub) * sub                # sublane-aligned row bound

    # Advisory cost estimate (matmul FLOPs dominate; one rsqrt per row).
    cost = pl.CostEstimate(
        flops=int(2 * M * D * D + 7 * M * D),
        transcendentals=int(M),
        bytes_accessed=int(M * D * (xi + oi) + D * D * wi + 2 * D * 4),
    )

    def compiler_params(est_vmem, semantics):
        kw = dict(dimension_semantics=semantics)
        if est_vmem > (12 << 20):
            kw["vmem_limit_bytes"] = int(min(est_vmem + (8 << 20),
                                             max(vmem_cap - (4 << 20), 16 << 20)))
        return pltpu.CompilerParams(**kw)

    # ---- choose the resident-weight row tile from the VMEM budget ----------
    cands = [c for c in (1024, 512, 256, 128, 64, 32, 16, 8) if c % sub == 0] or [sub]
    if tile_m is not None:
        cands = [max(sub, (int(tile_m) // sub) * sub)] + cands

    tm, n_chunks, est = None, 1, None
    for c in cands:
        t = min(c, m_cap)
        nc = _pick_chunks(t, sub)
        e = _resident_footprint(t, D, xi, oi, wi, nc, True)
        if e <= budget:
            tm, n_chunks, est = t, nc, e
            break
    if tm is None:
        tm = min(sub, m_cap)
        n_chunks = _pick_chunks(tm, sub)
        est = _resident_footprint(tm, D, xi, oi, wi, n_chunks, True)

    resident_ok = (est <= budget) and (tm >= min(128, m_cap))
    use_n_tiling = (not resident_ok) and (D % 128 == 0)
    # TODO(synk): if the resident weight does not fit and D % 128 != 0, pad the
    # feature dim to a multiple of 128 before N-tiling instead of over-subscribing VMEM.

    if not use_n_tiling:
        grid = (pl.cdiv(M, tm),)
        chunk_rows = tm // n_chunks
        kernel = _make_resident_kernel(D, n_chunks, chunk_rows)

        def build(single_buffer_invariants):
            inv_kw = ({"pipeline_mode": pl.Buffered(1)}
                      if single_buffer_invariants else {})
            e = _resident_footprint(tm, D, xi, oi, wi, n_chunks,
                                    single_buffer_invariants)
            return pl.pallas_call(
                kernel,
                out_shape=jax.ShapeDtypeStruct((M, D), x.dtype),
                grid_spec=pltpu.PrefetchScalarGridSpec(
                    num_scalar_prefetch=0,
                    grid=grid,
                    in_specs=[
                        pl.BlockSpec((tm, D), lambda i: (i, 0)),            # x rows (streamed)
                        pl.BlockSpec((D, D), lambda i: (0, 0), **inv_kw),   # folded W.T (invariant)
                        pl.BlockSpec((1, D), lambda i: (0, 0), **inv_kw),   # fused bias (invariant)
                    ],
                    out_specs=pl.BlockSpec((tm, D), lambda i: (i, 0)),
                ),
                compiler_params=compiler_params(e, ("parallel",)),
                cost_estimate=cost,
            )

        try:
            out2 = build(True)(x2, w_folded, bias2)
        except Exception:
            # Fallback if single-buffering via pipeline_mode is unsupported.
            out2 = build(False)(x2, w_folded, bias2)
        return out2.reshape(orig_shape)

    # ---- N-tiled path (large D): stream (D, tn) weight stripes --------------
    tn = next(t for t in (1024, 512, 256, 128) if D % t == 0)

    def ntiled_footprint(t):
        return (2 * D * tn * wi        # weight stripe, double-buffered
                + 2 * t * D * xi       # x tile
                + 2 * t * tn * oi      # out tile
                + t * D * wi           # bf16 normalized-row scratch
                + 3 * t * D * 4        # f32 LN temporaries (j == 0 only)
                + 4 * tn * 4)

    tm2 = None
    for c in cands:
        t = min(c, m_cap)
        if ntiled_footprint(t) <= budget:
            tm2 = t
            break
    if tm2 is None:
        tm2 = min(sub, m_cap)

    kernel = _make_ntiled_kernel(D)
    e = ntiled_footprint(tm2)
    grid = (pl.cdiv(M, tm2), D // tn)
    out2 = pl.pallas_call(
        kernel,
        out_shape=jax.ShapeDtypeStruct((M, D), x.dtype),
        grid_spec=pltpu.PrefetchScalarGridSpec(
            num_scalar_prefetch=0,
            grid=grid,
            in_specs=[
                pl.BlockSpec((tm2, D), lambda i, j: (i, 0)),   # x rows (constant over j -> no re-DMA)
                pl.BlockSpec((D, tn), lambda i, j: (0, j)),    # weight N-stripe
                pl.BlockSpec((1, tn), lambda i, j: (0, j)),    # bias N-stripe
            ],
            out_specs=pl.BlockSpec((tm2, tn), lambda i, j: (i, j)),
            scratch_shapes=[pltpu.VMEM((tm2, D), w_folded.dtype)],
        ),
        compiler_params=compiler_params(e, ("parallel", "arbitrary")),
        cost_estimate=cost,
    )(x2, w_folded, bias2)
    return out2.reshape(orig_shape)


# ---------------------------------------------------------------------------
# References
# ---------------------------------------------------------------------------
def _reference_same_math(x, w_folded, bias_folded):
    """Mirrors the kernel math (f32 one-pass LN stats, bf16 MXU operands)."""
    D = x.shape[-1]
    xf = x.astype(jnp.float32)
    mean = jnp.mean(xf, axis=-1, keepdims=True)
    var = jnp.maximum(jnp.mean(xf * xf, axis=-1, keepdims=True) - mean * mean, 0.0)
    xhat = (xf - mean) * jax.lax.rsqrt(var + EPS)
    out = jnp.dot(xhat.reshape(-1, D).astype(w_folded.dtype), w_folded,
                  preferred_element_type=jnp.float32) + bias_folded
    return out.reshape(x.shape).astype(x.dtype)


def _reference_f32(x, gamma, beta, w, b):
    """Pure-f32 PyTorch semantics: Linear(LayerNorm(x))."""
    D = x.shape[-1]
    xf = x.astype(jnp.float32)
    mean = jnp.mean(xf, axis=-1, keepdims=True)
    var = jnp.mean((xf - mean) ** 2, axis=-1, keepdims=True)
    y = (xf - mean) * jax.lax.rsqrt(var + EPS) * gamma + beta
    out = jnp.dot(y.reshape(-1, D), jnp.asarray(w, jnp.float32).T,
                  preferred_element_type=jnp.float32,
                  precision=jax.lax.Precision.HIGHEST) + b
    return out.reshape(x.shape).astype(x.dtype)


if __name__ == "__main__":
    B, S, D = 2, 8, 32   # small demo shape; `dim` (normalized axis) last
    key = jax.random.PRNGKey(0)
    kx, kg, kb, kw, kbb = jax.random.split(key, 5)

    x = jax.random.normal(kx, (B, S, D), dtype=jnp.float32)
    gamma = jnp.ones((D,), jnp.float32) + 0.1 * jax.random.normal(kg, (D,), jnp.float32)
    beta = 0.1 * jax.random.normal(kb, (D,), jnp.float32)
    w = jax.random.normal(kw, (D, D), dtype=jnp.float32) / jnp.sqrt(D)
    b = 0.1 * jax.random.normal(kbb, (D,), dtype=jnp.float32)

    # One-time setup: hoisted transpose + gamma/beta folding + bf16 down-cast.
    w_folded, bias_folded = prepare_prenorm_linear_params(gamma, beta, w, b)

    out = prenorm_linear(x, w_folded, bias_folded)
    out = jax.block_until_ready(out)
    assert out.shape == (B, S, D)

    # Tight check vs a reference using the same math (bf16 MXU, f32 accumulate).
    ref_tight = _reference_same_math(x, w_folded, bias_folded)
    assert jnp.allclose(out, ref_tight, atol=1e-2, rtol=1e-2), (
        "tight mismatch", float(jnp.max(jnp.abs(out - ref_tight))))

    # Loose check vs pure-f32 PyTorch semantics (bf16 weight cast => ~1e-2 rel).
    ref_f32 = _reference_f32(x, gamma, beta, w, b)
    assert jnp.allclose(out, ref_f32, atol=5e-2, rtol=5e-2), (
        "f32 mismatch", float(jnp.max(jnp.abs(out - ref_f32))))

    print("KERNEL_OK")
</pallas_src>

<mosaic_0001>
module attributes {stable_mosaic.version = 11 : i64} {
  func.func @kernel(%arg0: i32, %arg1: memref<16x32xf32, #tpu.memory_space<vmem>>, %arg2: memref<32x32xbf16, #tpu.memory_space<vmem>>, %arg3: memref<1x32xf32, #tpu.memory_space<vmem>>, %arg4: memref<16x32xf32, #tpu.memory_space<vmem>>) attributes {dimension_semantics = [#tpu.dimension_semantics<parallel>], iteration_bounds = array<i64: 1>, scalar_prefetch = 0 : i64, scratch_operands = 0 : i64, tpu.core_type = #tpu.core_type<tc>, window_params = [{transform_indices = @transform_0, window_bounds = array<i64: 16, 32>}, {pipeline_mode = #tpu.pipeline_mode<synchronous>, transform_indices = @transform_1, window_bounds = array<i64: 32, 32>}, {pipeline_mode = #tpu.pipeline_mode<synchronous>, transform_indices = @transform_2, window_bounds = array<i64: 1, 32>}, {transform_indices = @transform_3, window_bounds = array<i64: 16, 32>}]} {
    %c0 = arith.constant 0 : index
    %c0_0 = arith.constant 0 : index
    %0 = vector.load %arg3[%c0, %c0_0] : memref<1x32xf32, #tpu.memory_space<vmem>>, vector<1x32xf32>
    %c0_1 = arith.constant 0 : index
    %c0_2 = arith.constant 0 : index
    %1 = vector.load %arg1[%c0_1, %c0_2] : memref<16x32xf32, #tpu.memory_space<vmem>>, vector<8x32xf32>
    %cst = arith.constant dense<0.000000e+00> : vector<8xf32>
    %2 = vector.multi_reduction <add>, %1, %cst [1] : vector<8x32xf32> to vector<8xf32>
    %3 = vector.shape_cast %2 : vector<8xf32> to vector<8x1xf32>
    %4 = arith.mulf %1, %1 : vector<8x32xf32>
    %cst_3 = arith.constant dense<0.000000e+00> : vector<8xf32>
    %5 = vector.multi_reduction <add>, %4, %cst_3 [1] : vector<8x32xf32> to vector<8xf32>
    %6 = vector.shape_cast %5 : vector<8xf32> to vector<8x1xf32>
    %cst_4 = arith.constant 3.125000e-02 : f32
    %7 = vector.broadcast %cst_4 : f32 to vector<8x1xf32>
    %8 = arith.mulf %3, %7 : vector<8x1xf32>
    %cst_5 = arith.constant 3.125000e-02 : f32
    %9 = vector.broadcast %cst_5 : f32 to vector<8x1xf32>
    %10 = arith.mulf %6, %9 : vector<8x1xf32>
    %11 = arith.mulf %8, %8 : vector<8x1xf32>
    %12 = arith.subf %10, %11 : vector<8x1xf32>
    %cst_6 = arith.constant 0.000000e+00 : f32
    %13 = vector.broadcast %cst_6 : f32 to vector<8x1xf32>
    %14 = arith.maximumf %12, %13 : vector<8x1xf32>
    %15 = vector.broadcast %8 : vector<8x1xf32> to vector<8x32xf32>
    %16 = arith.subf %1, %15 : vector<8x32xf32>
    %cst_7 = arith.constant 9.99999974E-6 : f32
    %17 = vector.broadcast %cst_7 : f32 to vector<8x1xf32>
    %18 = arith.addf %14, %17 : vector<8x1xf32>
    %19 = math.rsqrt %18 : vector<8x1xf32>
    %20 = vector.broadcast %19 : vector<8x1xf32> to vector<8x32xf32>
    %21 = arith.mulf %16, %20 : vector<8x32xf32>
    %22 = arith.truncf %21 : vector<8x32xf32> to vector<8x32xbf16>
    %c0_8 = arith.constant 0 : index
    %c0_9 = arith.constant 0 : index
    %23 = vector.load %arg2[%c0_8, %c0_9] : memref<32x32xbf16, #tpu.memory_space<vmem>>, vector<32x32xbf16>
    %cst_10 = arith.constant dense<0.000000e+00> : vector<8x32xf32>
    %24 = tpu.matmul %22, %23, %cst_10 {dimension_numbers = #tpu.dot_dimension_numbers<[1], [0], [0], [1], [0, 0, 1, 1], [], []>} : vector<8x32xbf16>, vector<32x32xbf16>, vector<8x32xf32> -> vector<8x32xf32>
    %25 = vector.broadcast %0 : vector<1x32xf32> to vector<8x32xf32>
    %26 = arith.addf %24, %25 : vector<8x32xf32>
    %c0_11 = arith.constant 0 : index
    %c0_12 = arith.constant 0 : index
    %27 = vector.load %arg4[%c0_11, %c0_12] : memref<16x32xf32, #tpu.memory_space<vmem>>, vector<8x32xf32>
    tpu.vector_store %arg4[%c0_11, %c0_12], %26 {strides = array<i32>} : memref<16x32xf32, #tpu.memory_space<vmem>>, vector<8x32xf32>,
    %c8 = arith.constant 8 : index
    %c0_13 = arith.constant 0 : index
    %28 = vector.load %arg1[%c8, %c0_13] : memref<16x32xf32, #tpu.memory_space<vmem>>, vector<8x32xf32>
    %cst_14 = arith.constant dense<0.000000e+00> : vector<8xf32>
    %29 = vector.multi_reduction <add>, %28, %cst_14 [1] : vector<8x32xf32> to vector<8xf32>
    %30 = vector.shape_cast %29 : vector<8xf32> to vector<8x1xf32>
    %31 = arith.mulf %28, %28 : vector<8x32xf32>
    %cst_15 = arith.constant dense<0.000000e+00> : vector<8xf32>
    %32 = vector.multi_reduction <add>, %31, %cst_15 [1] : vector<8x32xf32> to vector<8xf32>
    %33 = vector.shape_cast %32 : vector<8xf32> to vector<8x1xf32>
    %cst_16 = arith.constant 3.125000e-02 : f32
    %34 = vector.broadcast %cst_16 : f32 to vector<8x1xf32>
    %35 = arith.mulf %30, %34 : vector<8x1xf32>
    %cst_17 = arith.constant 3.125000e-02 : f32
    %36 = vector.broadcast %cst_17 : f32 to vector<8x1xf32>
    %37 = arith.mulf %33, %36 : vector<8x1xf32>
    %38 = arith.mulf %35, %35 : vector<8x1xf32>
    %39 = arith.subf %37, %38 : vector<8x1xf32>
    %cst_18 = arith.constant 0.000000e+00 : f32
    %40 = vector.broadcast %cst_18 : f32 to vector<8x1xf32>
    %41 = arith.maximumf %39, %40 : vector<8x1xf32>
    %42 = vector.broadcast %35 : vector<8x1xf32> to vector<8x32xf32>
    %43 = arith.subf %28, %42 : vector<8x32xf32>
    %cst_19 = arith.constant 9.99999974E-6 : f32
    %44 = vector.broadcast %cst_19 : f32 to vector<8x1xf32>
    %45 = arith.addf %41, %44 : vector<8x1xf32>
    %46 = math.rsqrt %45 : vector<8x1xf32>
    %47 = vector.broadcast %46 : vector<8x1xf32> to vector<8x32xf32>
    %48 = arith.mulf %43, %47 : vector<8x32xf32>
    %49 = arith.truncf %48 : vector<8x32xf32> to vector<8x32xbf16>
    %c0_20 = arith.constant 0 : index
    %c0_21 = arith.constant 0 : index
    %50 = vector.load %arg2[%c0_20, %c0_21] : memref<32x32xbf16, #tpu.memory_space<vmem>>, vector<32x32xbf16>
    %cst_22 = arith.constant dense<0.000000e+00> : vector<8x32xf32>
    %51 = tpu.matmul %49, %50, %cst_22 {dimension_numbers = #tpu.dot_dimension_numbers<[1], [0], [0], [1], [0, 0, 1, 1], [], []>} : vector<8x32xbf16>, vector<32x32xbf16>, vector<8x32xf32> -> vector<8x32xf32>
    %52 = vector.broadcast %0 : vector<1x32xf32> to vector<8x32xf32>
    %53 = arith.addf %51, %52 : vector<8x32xf32>
    %c8_23 = arith.constant 8 : index
    %c0_24 = arith.constant 0 : index
    %54 = vector.load %arg4[%c8_23, %c0_24] : memref<16x32xf32, #tpu.memory_space<vmem>>, vector<8x32xf32>
    tpu.vector_store %arg4[%c8_23, %c0_24], %53 {strides = array<i32>} : memref<16x32xf32, #tpu.memory_space<vmem>>, vector<8x32xf32>,
    return
  }
  func.func @transform_0(%arg0: i32) -> (i32, i32) {
    %c0_i32 = arith.constant 0 : i32
    %c0_i32_0 = arith.constant 0 : i32
    return %arg0, %c0_i32 : i32, i32
  }
  func.func @transform_1(%arg0: i32) -> (i32, i32) {
    %c0_i32 = arith.constant 0 : i32
    %c0_i32_0 = arith.constant 0 : i32
    %c0_i32_1 = arith.constant 0 : i32
    return %c0_i32, %c0_i32_0 : i32, i32
  }
  func.func @transform_2(%arg0: i32) -> (i32, i32) {
    %c0_i32 = arith.constant 0 : i32
    %c0_i32_0 = arith.constant 0 : i32
    %c0_i32_1 = arith.constant 0 : i32
    return %c0_i32, %c0_i32_0 : i32, i32
  }
  func.func @transform_3(%arg0: i32) -> (i32, i32) {
    %c0_i32 = arith.constant 0 : i32
    %c0_i32_0 = arith.constant 0 : i32
    return %arg0, %c0_i32 : i32, i32
  }
}

module attributes {stable_mosaic.version = 11 : i64} {
  func.func @kernel(%arg0: i32, %arg1: memref<16x32xf32, #tpu.memory_space<vmem>>, %arg2: memref<32x32xbf16, #tpu.memory_space<vmem>>, %arg3: memref<1x32xf32, #tpu.memory_space<vmem>>, %arg4: memref<16x32xf32, #tpu.memory_space<vmem>>) attributes {dimension_semantics = [#tpu.dimension_semantics<parallel>], iteration_bounds = array<i64: 1>, scalar_prefetch = 0 : i64, scratch_operands = 0 : i64, tpu.core_type = #tpu.core_type<tc>, window_params = [{transform_indices = @transform_0, window_bounds = array<i64: 16, 32>}, {pipeline_mode = #tpu.pipeline_mode<synchronous>, transform_indices = @transform_1, window_bounds = array<i64: 32, 32>}, {pipeline_mode = #tpu.pipeline_mode<synchronous>, transform_indices = @transform_2, window_bounds = array<i64: 1, 32>}, {transform_indices = @transform_3, window_bounds = array<i64: 16, 32>}]} {
    %c0 = arith.constant 0 : index
    %c0_0 = arith.constant 0 : index
    %0 = vector.load %arg3[%c0, %c0_0] : memref<1x32xf32, #tpu.memory_space<vmem>>, vector<1x32xf32>
    %c0_1 = arith.constant 0 : index
    %c0_2 = arith.constant 0 : index
    %1 = vector.load %arg1[%c0_1, %c0_2] : memref<16x32xf32, #tpu.memory_space<vmem>>, vector<8x32xf32>
    %cst = arith.constant dense<0.000000e+00> : vector<8xf32>
    %2 = vector.multi_reduction <add>, %1, %cst [1] : vector<8x32xf32> to vector<8xf32>
    %3 = vector.shape_cast %2 : vector<8xf32> to vector<8x1xf32>
    %4 = arith.mulf %1, %1 : vector<8x32xf32>
    %cst_3 = arith.constant dense<0.000000e+00> : vector<8xf32>
    %5 = vector.multi_reduction <add>, %4, %cst_3 [1] : vector<8x32xf32> to vector<8xf32>
    %6 = vector.shape_cast %5 : vector<8xf32> to vector<8x1xf32>
    %cst_4 = arith.constant 3.125000e-02 : f32
    %7 = vector.broadcast %cst_4 : f32 to vector<8x1xf32>
    %8 = arith.mulf %3, %7 : vector<8x1xf32>
    %cst_5 = arith.constant 3.125000e-02 : f32
    %9 = vector.broadcast %cst_5 : f32 to vector<8x1xf32>
    %10 = arith.mulf %6, %9 : vector<8x1xf32>
    %11 = arith.mulf %8, %8 : vector<8x1xf32>
    %12 = arith.subf %10, %11 : vector<8x1xf32>
    %cst_6 = arith.constant 0.000000e+00 : f32
    %13 = vector.broadcast %cst_6 : f32 to vector<8x1xf32>
    %14 = arith.maximumf %12, %13 : vector<8x1xf32>
    %15 = vector.broadcast %8 : vector<8x1xf32> to vector<8x32xf32>
    %16 = arith.subf %1, %15 : vector<8x32xf32>
    %cst_7 = arith.constant 9.99999974E-6 : f32
    %17 = vector.broadcast %cst_7 : f32 to vector<8x1xf32>
    %18 = arith.addf %14, %17 : vector<8x1xf32>
    %19 = math.rsqrt %18 : vector<8x1xf32>
    %20 = vector.broadcast %19 : vector<8x1xf32> to vector<8x32xf32>
    %21 = arith.mulf %16, %20 : vector<8x32xf32>
    %22 = arith.truncf %21 : vector<8x32xf32> to vector<8x32xbf16>
    %c0_8 = arith.constant 0 : index
    %c0_9 = arith.constant 0 : index
    %23 = vector.load %arg2[%c0_8, %c0_9] : memref<32x32xbf16, #tpu.memory_space<vmem>>, vector<32x32xbf16>
    %cst_10 = arith.constant dense<0.000000e+00> : vector<8x32xf32>
    %24 = tpu.matmul %22, %23, %cst_10 {dimension_numbers = #tpu.dot_dimension_numbers<[1], [0], [0], [1], [0, 0, 1, 1], [], []>} : vector<8x32xbf16>, vector<32x32xbf16>, vector<8x32xf32> -> vector<8x32xf32>
    %25 = vector.broadcast %0 : vector<1x32xf32> to vector<8x32xf32>
    %26 = arith.addf %24, %25 : vector<8x32xf32>
    %c0_11 = arith.constant 0 : index
    %c0_12 = arith.constant 0 : index
    %27 = vector.load %arg4[%c0_11, %c0_12] : memref<16x32xf32, #tpu.memory_space<vmem>>, vector<8x32xf32>
    tpu.vector_store %arg4[%c0_11, %c0_12], %26 {strides = array<i32>} : memref<16x32xf32, #tpu.memory_space<vmem>>, vector<8x32xf32>,
    %c8 = arith.constant 8 : index
    %c0_13 = arith.constant 0 : index
    %28 = vector.load %arg1[%c8, %c0_13] : memref<16x32xf32, #tpu.memory_space<vmem>>, vector<8x32xf32>
    %cst_14 = arith.constant dense<0.000000e+00> : vector<8xf32>
    %29 = vector.multi_reduction <add>, %28, %cst_14 [1] : vector<8x32xf32> to vector<8xf32>
    %30 = vector.shape_cast %29 : vector<8xf32> to vector<8x1xf32>
    %31 = arith.mulf %28, %28 : vector<8x32xf32>
    %cst_15 = arith.constant dense<0.000000e+00> : vector<8xf32>
    %32 = vector.multi_reduction <add>, %31, %cst_15 [1] : vector<8x32xf32> to vector<8xf32>
    %33 = vector.shape_cast %32 : vector<8xf32> to vector<8x1xf32>
    %cst_16 = arith.constant 3.125000e-02 : f32
    %34 = vector.broadcast %cst_16 : f32 to vector<8x1xf32>
    %35 = arith.mulf %30, %34 : vector<8x1xf32>
    %cst_17 = arith.constant 3.125000e-02 : f32
    %36 = vector.broadcast %cst_17 : f32 to vector<8x1xf32>
    %37 = arith.mulf %33, %36 : vector<8x1xf32>
    %38 = arith.mulf %35, %35 : vector<8x1xf32>
    %39 = arith.subf %37, %38 : vector<8x1xf32>
    %cst_18 = arith.constant 0.000000e+00 : f32
    %40 = vector.broadcast %cst_18 : f32 to vector<8x1xf32>
    %41 = arith.maximumf %39, %40 : vector<8x1xf32>
    %42 = vector.broadcast %35 : vector<8x1xf32> to vector<8x32xf32>
    %43 = arith.subf %28, %42 : vector<8x32xf32>
    %cst_19 = arith.constant 9.99999974E-6 : f32
    %44 = vector.broadcast %cst_19 : f32 to vector<8x1xf32>
    %45 = arith.addf %41, %44 : vector<8x1xf32>
    %46 = math.rsqrt %45 : vector<8x1xf32>
    %47 = vector.broadcast %46 : vector<8x1xf32> to vector<8x32xf32>
    %48 = arith.mulf %43, %47 : vector<8x32xf32>
    %49 = arith.truncf %48 : vector<8x32xf32> to vector<8x32xbf16>
    %c0_20 = arith.constant 0 : index
    %c0_21 = arith.constant 0 : index
    %50 = vector.load %arg2[%c0_20, %c0_21] : memref<32x32xbf16, #tpu.memory_space<vmem>>, vector<32x32xbf16>
    %cst_22 = arith.constant dense<0.000000e+00> : vector<8x32xf32>
    %51 = tpu.matmul %49, %50, %cst_22 {dimension_numbers = #tpu.dot_dimension_numbers<[1], [0], [0], [1], [0, 0, 1, 1], [], []>} : vector<8x32xbf16>, vector<32x32xbf16>, vector<8x32xf32> -> vector<8x32xf32>
    %52 = vector.broadcast %0 : vector<1x32xf32> to vector<8x32xf32>
    %53 = arith.addf %51, %52 : vector<8x32xf32>
    %c8_23 = arith.constant 8 : index
    %c0_24 = arith.constant 0 : index
    %54 = vector.load %arg4[%c8_23, %c0_24] : memref<16x32xf32, #tpu.memory_space<vmem>>, vector<8x32xf32>
    tpu.vector_store %arg4[%c8_23, %c0_24], %53 {strides = array<i32>} : memref<16x32xf32, #tpu.memory_space<vmem>>, vector<8x32xf32>,
    return
  }
  func.func @transform_0(%arg0: i32) -> (i32, i32) {
    %c0_i32 = arith.constant 0 : i32
    %c0_i32_0 = arith.constant 0 : i32
    return %arg0, %c0_i32 : i32, i32
  }
  func.func @transform_1(%arg0: i32) -> (i32, i32) {
    %c0_i32 = arith.constant 0 : i32
    %c0_i32_0 = arith.constant 0 : i32
    %c0_i32_1 = arith.constant 0 : i32
    return %c0_i32, %c0_i32_0 : i32, i32
  }
  func.func @transform_2(%arg0: i32) -> (i32, i32) {
    %c0_i32 = arith.constant 0 : i32
    %c0_i32_0 = arith.constant 0 : i32
    %c0_i32_1 = arith.constant 0 : i32
    return %c0_i32, %c0_i32_0 : i32, i32
  }
  func.func @transform_3(%arg0: i32) -> (i32, i32) {
    %c0_i32 = arith.constant 0 : i32
    %c0_i32_0 = arith.constant 0 : i32
    return %arg0, %c0_i32 : i32, i32
  }
}

</mosaic_0001>

<bundles_post_ra>
// kernel: tpu_custom_call.1
= control target key start
LH: loop header
LB: loop body
LE: loop exit
PB: predicated region body
PF: predicated region fallthrough
CT: control target
= control target key end

     0   :  { %8 = vsyncpa [#allocation3], 0  ;;  %s358_s0 = inlined_call_operand.hbm [shape: f32[16,32], index: 0, kind: input, shape index: {}]   ;;  %s359_s1 = inlined_call_operand.hbm [shape: bf16[32,32], index: 1, kind: input, shape index: {}]   ;;  %s360_s2 = inlined_call_operand.vmem [shape: f32[1,32], index: 2, kind: input, shape index: {}]   ;;  %s361_s3 = inlined_call_operand.hbm [shape: f32[16,32], index: 3, kind: output, shape index: {}]  }
   0x1   :  { %9 = vsyncpa [#allocation6], 0 }
   0x2   :  { %10 = vsyncpa [#allocation4], 0  ;;  %s15_s14 = sshll.u32 %s358_s0, 4  ;;  %s305_s15 = smov [#allocation2]   ;;  %s16_s14 = int_to_ptr.hbm [resolvable:$true] %s15_s14 }
   0x3   :  { %s17_s16 = sshll.u32 %s305_s15, 4  ;;  %s28_s19 = sshll.u32 %s359_s1, 4  ;;  %s18_s16 = int_to_ptr.vmem [resolvable:$true] %s17_s16  ;;  %s29_s19 = int_to_ptr.hbm [resolvable:$true] %s28_s19 }
   0x4   :  { %s306_s20 = smov 128   ;;  %s307_s21 = smov 8  }
   0x5   :  { %23 = dma.hbm_to_vmem [thread:$0]  %s16_s14, 256, %s18_s16, [#allocation3], %s306_s20, %s306_s20, %s307_s21  }
   0x6   :  { %s308_s22 = smov [#allocation5]   ;;  %s309_s24 = smov 64  }
   0x7   :  { %s30_s23 = sshll.u32 %s308_s22, 4  ;;  %s310_s0 = smov 4   ;;  %s31_s23 = int_to_ptr.vmem [resolvable:$true] %s30_s23 }
   0x8   :  { %36 = dma.hbm_to_vmem [thread:$0]  %s29_s19, 256, %s31_s23, [#allocation6], %s309_s24, %s309_s24, %s310_s0  }
   0x9   :  { %299 = dma.done.wait [#allocation3], 256  }
   0xa   :  { %300 = vsyncadd [#allocation3], 4294967040 }
   0xb   :  { %301 = dma.done.wait [#allocation6], 256  }
   0xc   :  { %302 = vsyncadd [#allocation6], 4294967040  ;;  %vm50_vm0 = vcmask 261120   ;;  %v49_v0 = vld [vmem:[#allocation2] sm:$0xff]  ;;  %v113_v3 = vld [vmem:[#allocation2 + $0x8] sm:$0xff]  ;;  %s311_s26 = smov [#allocation7]  }
   0xd   :  { %v51_v1 = vsel %vm50_vm0, %v49_v0, 0.0  ;;  %v54_v2 = vmul.f32 %v49_v0, %v49_v0  ;;  %v117_v5 = vmul.f32 %v113_v3, %v113_v3  ;;  %v114_v6 = vsel %vm50_vm0, %v113_v3, 0.0  ;;  %v212_v8 = vld [vmem:[#allocation5 + $0x8] sm:$0xff]  ;;  %v211_v9 = vld [vmem:[#allocation5] sm:$0xff]  ;;  %v222_v48 = vld [vmem:[%s360_s2] ss:$0 sm:$0xff] }
   0xe   :  { %52 = vadd.xlane.f32.xlu0 %v51_v1  ;;  %105 = vmatpush.bf16.msra.mxu0 %v212_v8  ;;  %v214_v12 = vld [vmem:[#allocation5 + $0x8] sm:$0xff]  ;;  %v213_v16 = vld [vmem:[#allocation5] sm:$0xff]  ;;  %s177_s27 = sshll.u32 %s311_s26, 4  ;;  %s179_s30 = sshll.u32 %s361_s3, 4  ;;  %s178_s27 = int_to_ptr.vmem [resolvable:$true] %s177_s27  ;;  %s180_s30 = int_to_ptr.hbm [resolvable:$true] %s179_s30 }
   0xf   :  { %v55_v4 = vsel %vm50_vm0, %v54_v2, 0.0  ;;  %v118_v7 = vsel %vm50_vm0, %v117_v5, 0.0  ;;  %165 = vmatpush.bf16.msra.mxu1 %v214_v12 }
  0x10   :  { %56 = vadd.xlane.f32.xlu1 %v55_v4 }
  0x12   :  { %106 = vmatpush.bf16.msra.mxu0 %v211_v9 }
  0x13   :  { %166 = vmatpush.bf16.msra.mxu1 %v213_v16 }
  0x16   :  { %115 = vadd.xlane.f32.xlu0 %v114_v6 }
  0x18   :  { %119 = vadd.xlane.f32.xlu1 %v118_v7 }
  0x81   :  { %v53_v10 = vpop.xlane.xlu0 %52 }
  0x82   :  { %v58_v11 = vmul.f32 0.03125, %v53_v10 }
  0x83   :  { %v57_v13 = vpop.xlane.xlu1 %56 }
  0x84   :  { %v60_v14 = vmul.f32 %v58_v11, %v58_v11  ;;  %v59_v15 = vmul.f32 0.03125, %v57_v13  ;;  %v63_v35 = vsub.f32 %v49_v0, %v58_v11 }
  0x86   :  { %v61_v17 = vsub.f32 %v59_v15, %v60_v14 }
  0x88   :  { %v62_v18 = vmax.f32 %v61_v17, 0.0 }
  0x89   :  { %v116_v19 = vpop.xlane.xlu0 %115 }
  0x8a   :  { %v64_v20 = vadd.f32 1e-05, %v62_v18  ;;  %v121_v21 = vmul.f32 0.03125, %v116_v19 }
  0x8b   :  { %v120_v22 = vpop.xlane.xlu1 %119 }
  0x8c   :  { %223 = vrsqrt.f32 %v64_v20  ;;  %v123_v23 = vmul.f32 %v121_v21, %v121_v21  ;;  %v122_v24 = vmul.f32 0.03125, %v120_v22  ;;  %vm71_vm2 = vweird.f32 %v64_v20 }
  0x8d   :  { %v126_v44 = vsub.f32 %v113_v3, %v121_v21 }
  0x8e   :  { %v124_v25 = vsub.f32 %v122_v24, %v123_v23 }
  0x90   :  { %v125_v26 = vmax.f32 %v124_v25, 0.0 }
  0x92   :  { %v224_v27 = vpop.eup %223  ;;  %v127_v29 = vadd.f32 1e-05, %v125_v26 }
  0x93   :  { %v66_v28 = vmul.f32 %v224_v27, %v64_v20  ;;  %vm72_vm1 = vweird.f32 %v224_v27 }
  0x94   :  { %225 = vrsqrt.f32 %v127_v29  ;;  %vm73_vm3 = vmor %vm71_vm2, %vm72_vm1  ;;  %vm134_vm5 = vweird.f32 %v127_v29 }
  0x95   :  { %v67_v30 = vmul.f32 %v224_v27, %v66_v28 }
  0x97   :  { %v68_v31 = vmul.f32 0.5, %v67_v30 }
  0x99   :  { %v69_v32 = vsub.f32 1.5, %v68_v31 }
  0x9a   :  { %v226_v33 = vpop.eup %225 }
  0x9b   :  { %v70_v34 = vmul.f32 %v224_v27, %v69_v32  ;;  %v129_v36 = vmul.f32 %v226_v33, %v127_v29  ;;  %vm135_vm4 = vweird.f32 %v226_v33 }
  0x9c   :  { %vm136_vm6 = vmor %vm134_vm5, %vm135_vm4 }
  0x9d   :  { %v74_v37 = vsel %vm73_vm3, %v224_v27, %v70_v34  ;;  %v130_v38 = vmul.f32 %v226_v33, %v129_v36 }
  0x9e   :  { %v75_v39 = vmul.f32 %v74_v37, %v63_v35 }
  0x9f   :  { %v131_v40 = vmul.f32 0.5, %v130_v38 }
  0xa0   :  { %v76_v41 = vpack.c.bf16 %v75_v39, %v75_v39 }
  0xa1   :  { %v132_v42 = vsub.f32 1.5, %v131_v40 }
  0xa2   :  { %201 = vmatmul.msk.bf16.vlgmr.msra.gmra.mxu0 %vm50_vm0, %v76_v41 }
  0xa3   :  { %v133_v43 = vmul.f32 %v226_v33, %v132_v42 }
  0xa5   :  { %v137_v45 = vsel %vm136_vm6, %v226_v33, %v133_v43 }
  0xa6   :  { %v138_v46 = vmul.f32 %v137_v45, %v126_v44 }
  0xa8   :  { %v139_v47 = vpack.c.bf16 %v138_v46, %v138_v46 }
  0xaa   :  { %210 = vmatmul.msk.bf16.vlgmr.msra.gmra.mxu1 %vm50_vm0, %v139_v47 }
 0x11f   :  { %v108_v49 = vpop.f32.mrf.mxu0 }
 0x120   :  { %v109_v50 = vadd.f32 %v222_v48, %v108_v49 }
 0x122   :  { %112 = vst.msk [vmem:[#allocation7] sm:$0xff] %vm50_vm0, %v109_v50 }
 0x127   :  { %v110_v51 = vpop.f32.mrf.mxu0  ;;  %v168_v52 = vpop.f32.mrf.mxu1 }
 0x128   :  { %v169_v53 = vadd.f32 %v222_v48, %v168_v52 }
 0x12a   :  { %172 = vst.msk [vmem:[#allocation7 + $0x8] sm:$0xff] %vm50_vm0, %v169_v53 }
 0x12b   :  { %185 = dma.vmem_to_hbm [thread:$0]  %s178_s27, 256, %s180_s30, [#allocation4], %s306_s20, %s306_s20, %s307_s21  }
 0x12f   :  { %v170_v54 = vpop.f32.mrf.mxu1 }
 0x130   :  { %303 = dma.done.wait [#allocation4], 256  }
 0x131   :  { %304 = vsyncadd [#allocation4], 4294967040 }
 0x132   :  { %190 = vsyncpa [#allocation3], 1 }
 0x133   :  { %191 = vsyncpa [#allocation6], 1 }
 0x134   :  { %192 = vsyncpa [#allocation4], 1 }

// kernel: tpu_custom_call.1
= control target key start
LH: loop header
LB: loop body
LE: loop exit
PB: predicated region body
PF: predicated region fallthrough
CT: control target
= control target key end

     0   :  { %8 = vsyncpa [#allocation3], 0  ;;  %s358_s0 = inlined_call_operand.hbm [shape: f32[16,32], index: 0, kind: input, shape index: {}]   ;;  %s359_s1 = inlined_call_operand.hbm [shape: bf16[32,32], index: 1, kind: input, shape index: {}]   ;;  %s360_s2 = inlined_call_operand.vmem [shape: f32[1,32], index: 2, kind: input, shape index: {}]   ;;  %s361_s3 = inlined_call_operand.hbm [shape: f32[16,32], index: 3, kind: output, shape index: {}]  }
   0x1   :  { %9 = vsyncpa [#allocation6], 0 }
   0x2   :  { %10 = vsyncpa [#allocation4], 0  ;;  %s15_s14 = sshll.u32 %s358_s0, 4  ;;  %s305_s15 = smov [#allocation2]   ;;  %s16_s14 = int_to_ptr.hbm [resolvable:$true] %s15_s14 }
   0x3   :  { %s17_s16 = sshll.u32 %s305_s15, 4  ;;  %s28_s19 = sshll.u32 %s359_s1, 4  ;;  %s18_s16 = int_to_ptr.vmem [resolvable:$true] %s17_s16  ;;  %s29_s19 = int_to_ptr.hbm [resolvable:$true] %s28_s19 }
   0x4   :  { %s306_s20 = smov 128   ;;  %s307_s21 = smov 8  }
   0x5   :  { %23 = dma.hbm_to_vmem [thread:$0]  %s16_s14, 256, %s18_s16, [#allocation3], %s306_s20, %s306_s20, %s307_s21  }
   0x6   :  { %s308_s22 = smov [#allocation5]   ;;  %s309_s24 = smov 64  }
   0x7   :  { %s30_s23 = sshll.u32 %s308_s22, 4  ;;  %s310_s0 = smov 4   ;;  %s31_s23 = int_to_ptr.vmem [resolvable:$true] %s30_s23 }
   0x8   :  { %36 = dma.hbm_to_vmem [thread:$0]  %s29_s19, 256, %s31_s23, [#allocation6], %s309_s24, %s309_s24, %s310_s0  }
   0x9   :  { %299 = dma.done.wait [#allocation3], 256  }
   0xa   :  { %300 = vsyncadd [#allocation3], 4294967040 }
   0xb   :  { %301 = dma.done.wait [#allocation6], 256  }
   0xc   :  { %302 = vsyncadd [#allocation6], 4294967040  ;;  %vm50_vm0 = vcmask 261120   ;;  %v49_v0 = vld [vmem:[#allocation2] sm:$0xff]  ;;  %v113_v3 = vld [vmem:[#allocation2 + $0x8] sm:$0xff]  ;;  %s311_s26 = smov [#allocation7]  }
   0xd   :  { %v51_v1 = vsel %vm50_vm0, %v49_v0, 0.0  ;;  %v54_v2 = vmul.f32 %v49_v0, %v49_v0  ;;  %v117_v5 = vmul.f32 %v113_v3, %v113_v3  ;;  %v114_v6 = vsel %vm50_vm0, %v113_v3, 0.0  ;;  %v212_v8 = vld [vmem:[#allocation5 + $0x8] sm:$0xff]  ;;  %v211_v9 = vld [vmem:[#allocation5] sm:$0xff]  ;;  %v222_v48 = vld [vmem:[%s360_s2] ss:$0 sm:$0xff] }
   0xe   :  { %52 = vadd.xlane.f32.xlu0 %v51_v1  ;;  %105 = vmatpush.bf16.msra.mxu0 %v212_v8  ;;  %v214_v12 = vld [vmem:[#allocation5 + $0x8] sm:$0xff]  ;;  %v213_v16 = vld [vmem:[#allocation5] sm:$0xff]  ;;  %s177_s27 = sshll.u32 %s311_s26, 4  ;;  %s179_s30 = sshll.u32 %s361_s3, 4  ;;  %s178_s27 = int_to_ptr.vmem [resolvable:$true] %s177_s27  ;;  %s180_s30 = int_to_ptr.hbm [resolvable:$true] %s179_s30 }
   0xf   :  { %v55_v4 = vsel %vm50_vm0, %v54_v2, 0.0  ;;  %v118_v7 = vsel %vm50_vm0, %v117_v5, 0.0  ;;  %165 = vmatpush.bf16.msra.mxu1 %v214_v12 }
  0x10   :  { %56 = vadd.xlane.f32.xlu1 %v55_v4 }
  0x12   :  { %106 = vmatpush.bf16.msra.mxu0 %v211_v9 }
  0x13   :  { %166 = vmatpush.bf16.msra.mxu1 %v213_v16 }
  0x16   :  { %115 = vadd.xlane.f32.xlu0 %v114_v6 }
  0x18   :  { %119 = vadd.xlane.f32.xlu1 %v118_v7 }
  0x81   :  { %v53_v10 = vpop.xlane.xlu0 %52 }
  0x82   :  { %v58_v11 = vmul.f32 0.03125, %v53_v10 }
  0x83   :  { %v57_v13 = vpop.xlane.xlu1 %56 }
  0x84   :  { %v60_v14 = vmul.f32 %v58_v11, %v58_v11  ;;  %v59_v15 = vmul.f32 0.03125, %v57_v13  ;;  %v63_v35 = vsub.f32 %v49_v0, %v58_v11 }
  0x86   :  { %v61_v17 = vsub.f32 %v59_v15, %v60_v14 }
  0x88   :  { %v62_v18 = vmax.f32 %v61_v17, 0.0 }
  0x89   :  { %v116_v19 = vpop.xlane.xlu0 %115 }
  0x8a   :  { %v64_v20 = vadd.f32 1e-05, %v62_v18  ;;  %v121_v21 = vmul.f32 0.03125, %v116_v19 }
  0x8b   :  { %v120_v22 = vpop.xlane.xlu1 %119 }
  0x8c   :  { %223 = vrsqrt.f32 %v64_v20  ;;  %v123_v23 = vmul.f32 %v121_v21, %v121_v21  ;;  %v122_v24 = vmul.f32 0.03125, %v120_v22  ;;  %vm71_vm2 = vweird.f32 %v64_v20 }
  0x8d   :  { %v126_v44 = vsub.f32 %v113_v3, %v121_v21 }
  0x8e   :  { %v124_v25 = vsub.f32 %v122_v24, %v123_v23 }
  0x90   :  { %v125_v26 = vmax.f32 %v124_v25, 0.0 }
  0x92   :  { %v224_v27 = vpop.eup %223  ;;  %v127_v29 = vadd.f32 1e-05, %v125_v26 }
  0x93   :  { %v66_v28 = vmul.f32 %v224_v27, %v64_v20  ;;  %vm72_vm1 = vweird.f32 %v224_v27 }
  0x94   :  { %225 = vrsqrt.f32 %v127_v29  ;;  %vm73_vm3 = vmor %vm71_vm2, %vm72_vm1  ;;  %vm134_vm5 = vweird.f32 %v127_v29 }
  0x95   :  { %v67_v30 = vmul.f32 %v224_v27, %v66_v28 }
  0x97   :  { %v68_v31 = vmul.f32 0.5, %v67_v30 }
  0x99   :  { %v69_v32 = vsub.f32 1.5, %v68_v31 }
  0x9a   :  { %v226_v33 = vpop.eup %225 }
  0x9b   :  { %v70_v34 = vmul.f32 %v224_v27, %v69_v32  ;;  %v129_v36 = vmul.f32 %v226_v33, %v127_v29  ;;  %vm135_vm4 = vweird.f32 %v226_v33 }
  0x9c   :  { %vm136_vm6 = vmor %vm134_vm5, %vm135_vm4 }
  0x9d   :  { %v74_v37 = vsel %vm73_vm3, %v224_v27, %v70_v34  ;;  %v130_v38 = vmul.f32 %v226_v33, %v129_v36 }
  0x9e   :  { %v75_v39 = vmul.f32 %v74_v37, %v63_v35 }
  0x9f   :  { %v131_v40 = vmul.f32 0.5, %v130_v38 }
  0xa0   :  { %v76_v41 = vpack.c.bf16 %v75_v39, %v75_v39 }
  0xa1   :  { %v132_v42 = vsub.f32 1.5, %v131_v40 }
  0xa2   :  { %201 = vmatmul.msk.bf16.vlgmr.msra.gmra.mxu0 %vm50_vm0, %v76_v41 }
  0xa3   :  { %v133_v43 = vmul.f32 %v226_v33, %v132_v42 }
  0xa5   :  { %v137_v45 = vsel %vm136_vm6, %v226_v33, %v133_v43 }
  0xa6   :  { %v138_v46 = vmul.f32 %v137_v45, %v126_v44 }
  0xa8   :  { %v139_v47 = vpack.c.bf16 %v138_v46, %v138_v46 }
  0xaa   :  { %210 = vmatmul.msk.bf16.vlgmr.msra.gmra.mxu1 %vm50_vm0, %v139_v47 }
 0x11f   :  { %v108_v49 = vpop.f32.mrf.mxu0 }
 0x120   :  { %v109_v50 = vadd.f32 %v222_v48, %v108_v49 }
 0x122   :  { %112 = vst.msk [vmem:[#allocation7] sm:$0xff] %vm50_vm0, %v109_v50 }
 0x127   :  { %v110_v51 = vpop.f32.mrf.mxu0  ;;  %v168_v52 = vpop.f32.mrf.mxu1 }
 0x128   :  { %v169_v53 = vadd.f32 %v222_v48, %v168_v52 }
 0x12a   :  { %172 = vst.msk [vmem:[#allocation7 + $0x8] sm:$0xff] %vm50_vm0, %v169_v53 }
 0x12b   :  { %185 = dma.vmem_to_hbm [thread:$0]  %s178_s27, 256, %s180_s30, [#allocation4], %s306_s20, %s306_s20, %s307_s21  }
 0x12f   :  { %v170_v54 = vpop.f32.mrf.mxu1 }
 0x130   :  { %303 = dma.done.wait [#allocation4], 256  }
 0x131   :  { %304 = vsyncadd [#allocation4], 4294967040 }
 0x132   :  { %190 = vsyncpa [#allocation3], 1 }
 0x133   :  { %191 = vsyncpa [#allocation6], 1 }
 0x134   :  { %192 = vsyncpa [#allocation4], 1 }

</bundles_post_ra>
